<compile_context>
chip_gen: v7x
topology: tpu7x:2x2x1
jax: 0.10.0
libtpu: 0.0.40
codegen_flags: <defaults>
</compile_context>

<pallas_src>
import jax
import jax.numpy as jnp
from jax.experimental import pallas as pl
from jax.experimental.pallas import tpu as pltpu

_LANE = 128


def _make_kernel(number_to_compare: float, num_channels: int):
    bias1 = float(1.0 - number_to_compare)     # conv1 bias
    bias2 = float(number_to_compare + 1.0)     # conv2 bias

    def kernel(x_ref, o_ref):
        # x_ref: (bn, 9, T) block in VMEM, o_ref: (bn, 1, T).
        # Unrolled channel accumulation over lane-dense (bn, T) slices:
        # 8 VPU adds, no whole-block materialization, no XLU reduce.
        s = x_ref[:, 0, :].astype(jnp.float32)
        for k in range(1, num_channels):
            s = s + x_ref[:, k, :].astype(jnp.float32)
        a = jnp.maximum(s + bias1, 0.0)        # relu(conv1)
        b = jnp.maximum(bias2 - s, 0.0)        # relu(conv2)
        o_ref[:, 0, :] = (a * b).astype(o_ref.dtype)

    return kernel


def _choose_tiling(n: int, L: int, c: int, elem: int,
                   target_step_bytes: int, vmem_cap_bytes: int):
    """Pick (batch block bn, spatial tile) for one grid step."""
    # True (sublane-padded) VMEM bytes per (batch row, lane) of a
    # double-buffered block pair: input channels pad 9->16, output pads 1->8.
    padded_cols = 2 * elem * (16 + 8)
    # Real HBM traffic per (batch row, lane): 9 reads + 1 write.
    real_cols = elem * (c + 1)

    max_bn_lanes = max(vmem_cap_bytes // padded_cols, _LANE)   # VMEM cap on bn*tile
    want_bn_lanes = max(target_step_bytes // real_cols, _LANE)  # DMA-size target
    bn_lanes = int(min(want_bn_lanes, max_bn_lanes))

    if L >= bn_lanes:
        # Large spatial extent: one batch element per step, lane-dense tiles
        # (multiple of 128); last spatial block may be ragged (masked writes).
        bn = 1
        tile = max((min(bn_lanes, L) // _LANE) * _LANE, _LANE)
        if tile >= L:
            tile = L          # full-dim block, always layout-legal
    else:
        # Small boards: whole spatial axis per block, fold batch elements.
        tile = L
        bn = max(min(bn_lanes // max(L, 1), n), 1)
        # v7x has 2 TensorCores: keep >= 2 parallel grid steps when possible.
        if bn >= n and n >= 2:
            bn = pl.cdiv(n, 2)
    return bn, tile


def sudoku_numbers_in_cell_old(x: jax.Array, number_to_compare: float, *,
                               target_step_bytes: int = 4 << 20,
                               vmem_cap_bytes: int = 40 << 20) -> jax.Array:
    """x: (N, 9, H, W) -> (N, 1, H, W)."""
    n, c, h, w = x.shape
    assert c == 9, "expected 9 input channels (sudoku digits)"

    L = h * w
    x_flat = x.reshape(n, c, L)                 # free row-major reshape, no pad
    elem = jnp.dtype(x.dtype).itemsize

    bn, tile = _choose_tiling(n, L, c, elem, target_step_bytes, vmem_cap_bytes)
    grid = (pl.cdiv(n, bn), pl.cdiv(L, tile))   # ragged edge blocks are masked

    # VMEM budget using the sublane-PADDED footprint (+ slack), capped well
    # under v7x's 64 MiB physical VMEM.
    padded_block_bytes = 2 * elem * bn * tile * (16 + 8)
    vmem_limit = int(max(min(padded_block_bytes + (4 << 20), 48 << 20), 16 << 20))

    cost = pl.CostEstimate(
        flops=12 * n * L,                        # 8 adds + 2 bias + 2 relu-ish + mul
        transcendentals=0,
        bytes_accessed=elem * n * L * (c + 1),   # 9 channel reads + 1 write
    )

    kernel = _make_kernel(number_to_compare, c)

    out_flat = pl.pallas_call(
        kernel,
        out_shape=jax.ShapeDtypeStruct((n, 1, L), x.dtype),
        grid_spec=pltpu.PrefetchScalarGridSpec(
            num_scalar_prefetch=0,
            grid=grid,
            # Last two block dims are either full array dims (9 / 1 / L) or a
            # multiple of 128 lanes, satisfying the (8,128) rule.
            in_specs=[pl.BlockSpec((bn, c, tile), lambda b, s: (b, 0, s))],
            out_specs=pl.BlockSpec((bn, 1, tile), lambda b, s: (b, 0, s)),
        ),
        compiler_params=pltpu.CompilerParams(
            dimension_semantics=("parallel", "parallel"),
            vmem_limit_bytes=vmem_limit,
        ),
        cost_estimate=cost,
    )(x_flat)

    return out_flat.reshape(n, 1, h, w)          # free reshape, no slice


def _reference(x: jnp.ndarray, number_to_compare: float) -> jnp.ndarray:
    s = jnp.sum(x, axis=1, keepdims=True)
    a = jax.nn.relu(s + (1.0 - number_to_compare))
    b = jax.nn.relu(-s + (number_to_compare + 1.0))
    return a * b


if __name__ == "__main__":
    key = jax.random.PRNGKey(0)
    # Sudoku-like input: batch=2, 9 digit-channels, 9x9 board, values in [0, 1].
    x = jax.random.uniform(key, (2, 9, 9, 9), dtype=jnp.float32)
    number_to_compare = 1.0

    out = sudoku_numbers_in_cell_old(x, number_to_compare)
    out = jax.block_until_ready(out)

    ref = _reference(x, number_to_compare)
    assert out.shape == (2, 1, 9, 9)
    assert jnp.allclose(out, ref, atol=1e-5, rtol=1e-5), "mismatch vs reference"

    print("KERNEL_OK")
</pallas_src>

<mosaic_0001>
module attributes {stable_mosaic.version = 11 : i64} {
  func.func @kernel(%arg0: i32, %arg1: i32, %arg2: memref<1x9x81xf32, #tpu.memory_space<vmem>>, %arg3: memref<1x1x81xf32, #tpu.memory_space<vmem>>) attributes {dimension_semantics = [#tpu.dimension_semantics<parallel>, #tpu.dimension_semantics<parallel>], iteration_bounds = array<i64: 2, 1>, scalar_prefetch = 0 : i64, scratch_operands = 0 : i64, tpu.core_type = #tpu.core_type<tc>, window_params = [{transform_indices = @transform_0, window_bounds = array<i64: 1, 9, 81>}, {transform_indices = @transform_1, window_bounds = array<i64: 1, 1, 81>}]} {
    %c0 = arith.constant 0 : index
    %c0_0 = arith.constant 0 : index
    %c0_1 = arith.constant 0 : index
    %0 = vector.load %arg2[%c0, %c0_0, %c0_1] : memref<1x9x81xf32, #tpu.memory_space<vmem>>, vector<1x1x81xf32>
    %1 = vector.shape_cast %0 : vector<1x1x81xf32> to vector<1x81xf32>
    %c0_2 = arith.constant 0 : index
    %c1 = arith.constant 1 : index
    %c0_3 = arith.constant 0 : index
    %2 = vector.load %arg2[%c0_2, %c1, %c0_3] : memref<1x9x81xf32, #tpu.memory_space<vmem>>, vector<1x1x81xf32>
    %3 = vector.shape_cast %2 : vector<1x1x81xf32> to vector<1x81xf32>
    %4 = arith.addf %1, %3 : vector<1x81xf32>
    %c0_4 = arith.constant 0 : index
    %c2 = arith.constant 2 : index
    %c0_5 = arith.constant 0 : index
    %5 = vector.load %arg2[%c0_4, %c2, %c0_5] : memref<1x9x81xf32, #tpu.memory_space<vmem>>, vector<1x1x81xf32>
    %6 = vector.shape_cast %5 : vector<1x1x81xf32> to vector<1x81xf32>
    %7 = arith.addf %4, %6 : vector<1x81xf32>
    %c0_6 = arith.constant 0 : index
    %c3 = arith.constant 3 : index
    %c0_7 = arith.constant 0 : index
    %8 = vector.load %arg2[%c0_6, %c3, %c0_7] : memref<1x9x81xf32, #tpu.memory_space<vmem>>, vector<1x1x81xf32>
    %9 = vector.shape_cast %8 : vector<1x1x81xf32> to vector<1x81xf32>
    %10 = arith.addf %7, %9 : vector<1x81xf32>
    %c0_8 = arith.constant 0 : index
    %c4 = arith.constant 4 : index
    %c0_9 = arith.constant 0 : index
    %11 = vector.load %arg2[%c0_8, %c4, %c0_9] : memref<1x9x81xf32, #tpu.memory_space<vmem>>, vector<1x1x81xf32>
    %12 = vector.shape_cast %11 : vector<1x1x81xf32> to vector<1x81xf32>
    %13 = arith.addf %10, %12 : vector<1x81xf32>
    %c0_10 = arith.constant 0 : index
    %c5 = arith.constant 5 : index
    %c0_11 = arith.constant 0 : index
    %14 = vector.load %arg2[%c0_10, %c5, %c0_11] : memref<1x9x81xf32, #tpu.memory_space<vmem>>, vector<1x1x81xf32>
    %15 = vector.shape_cast %14 : vector<1x1x81xf32> to vector<1x81xf32>
    %16 = arith.addf %13, %15 : vector<1x81xf32>
    %c0_12 = arith.constant 0 : index
    %c6 = arith.constant 6 : index
    %c0_13 = arith.constant 0 : index
    %17 = vector.load %arg2[%c0_12, %c6, %c0_13] : memref<1x9x81xf32, #tpu.memory_space<vmem>>, vector<1x1x81xf32>
    %18 = vector.shape_cast %17 : vector<1x1x81xf32> to vector<1x81xf32>
    %19 = arith.addf %16, %18 : vector<1x81xf32>
    %c0_14 = arith.constant 0 : index
    %c7 = arith.constant 7 : index
    %c0_15 = arith.constant 0 : index
    %20 = vector.load %arg2[%c0_14, %c7, %c0_15] : memref<1x9x81xf32, #tpu.memory_space<vmem>>, vector<1x1x81xf32>
    %21 = vector.shape_cast %20 : vector<1x1x81xf32> to vector<1x81xf32>
    %22 = arith.addf %19, %21 : vector<1x81xf32>
    %c0_16 = arith.constant 0 : index
    %c8 = arith.constant 8 : index
    %c0_17 = arith.constant 0 : index
    %23 = vector.load %arg2[%c0_16, %c8, %c0_17] : memref<1x9x81xf32, #tpu.memory_space<vmem>>, vector<1x1x81xf32>
    %24 = vector.shape_cast %23 : vector<1x1x81xf32> to vector<1x81xf32>
    %25 = arith.addf %22, %24 : vector<1x81xf32>
    %cst = arith.constant 0.000000e+00 : f32
    %26 = vector.broadcast %cst : f32 to vector<1x81xf32>
    %27 = arith.addf %25, %26 : vector<1x81xf32>
    %cst_18 = arith.constant 0.000000e+00 : f32
    %28 = vector.broadcast %cst_18 : f32 to vector<1x81xf32>
    %29 = arith.maximumf %27, %28 : vector<1x81xf32>
    %cst_19 = arith.constant 2.000000e+00 : f32
    %30 = vector.broadcast %cst_19 : f32 to vector<1x81xf32>
    %31 = arith.subf %30, %25 : vector<1x81xf32>
    %cst_20 = arith.constant 0.000000e+00 : f32
    %32 = vector.broadcast %cst_20 : f32 to vector<1x81xf32>
    %33 = arith.maximumf %31, %32 : vector<1x81xf32>
    %34 = arith.mulf %29, %33 : vector<1x81xf32>
    %c0_21 = arith.constant 0 : index
    %c0_22 = arith.constant 0 : index
    %c0_23 = arith.constant 0 : index
    %35 = vector.load %arg3[%c0_21, %c0_22, %c0_23] : memref<1x1x81xf32, #tpu.memory_space<vmem>>, vector<1x1x81xf32>
    %36 = vector.shape_cast %35 : vector<1x1x81xf32> to vector<1x81xf32>
    %37 = vector.shape_cast %34 : vector<1x81xf32> to vector<1x1x81xf32>
    tpu.vector_store %arg3[%c0_21, %c0_22, %c0_23], %37 {strides = array<i32>} : memref<1x1x81xf32, #tpu.memory_space<vmem>>, vector<1x1x81xf32>,
    return
  }
  func.func @transform_0(%arg0: i32, %arg1: i32) -> (i32, i32, i32) {
    %c0_i32 = arith.constant 0 : i32
    %c0_i32_0 = arith.constant 0 : i32
    return %arg0, %c0_i32, %arg1 : i32, i32, i32
  }
  func.func @transform_1(%arg0: i32, %arg1: i32) -> (i32, i32, i32) {
    %c0_i32 = arith.constant 0 : i32
    %c0_i32_0 = arith.constant 0 : i32
    return %arg0, %c0_i32, %arg1 : i32, i32, i32
  }
}

</mosaic_0001>

<bundles_post_ra>
// kernel: tpu_custom_call.1
= control target key start
LH: loop header
LB: loop body
LE: loop exit
PB: predicated region body
PF: predicated region fallthrough
CT: control target
= control target key end

     0   :  { %6 = vsyncpa [#allocation3], 0  ;;  %s516_s0 = inlined_call_operand.vmem [shape: f32[2,9,81], index: 0, kind: input, shape index: {}]   ;;  %s517_s1 = inlined_call_operand.hbm [shape: f32[2,1,81], index: 1, kind: output, shape index: {}]  }
   0x1   :  { %8 = vsyncpa [#allocation3 + $0x1], 0  ;;  %s404_s6 = smov 0   ;;  %s406_s7 = smov 0  }
   0x2   :  { %s408_s8 = smov 0   ;;  %s410_s9 = smov 0  }
   0x3   :  { %s412_s10 = smov 0   ;;  %s414_s11 = smov 0  }
   0x4 LB: > { %s247_s12 = sadd.s32 4294967295, %s391_s11   ;;  %s248_s13 = sadd.s32 4294967294, %s391_s11   ;;  %s391_s11 = sphi %s414_s11, %s14_s11   ;;  %s387_s10 = sphi %s412_s10, %s524_s10   ;;  %s383_s9 = sphi %s410_s9, %s523_s9   ;;  %s379_s8 = sphi %s408_s8, %s522_s8   ;;  %s375_s7 = sphi %s406_s7, %s521_s7   ;;  %s371_s6 = sphi %s404_s6, %s520_s6  }
   0x5   : > { %s26_s14 = sadd.s32 1, %s387_s10  ;;  %s63_s15 = sadd.s32 1, %s379_s8 }
   0x6   : > { %p28_p0 = scmp.ge.s32.totalorder %s26_s14, 2  ;;  %p73_p1 = scmp.ne.s32.totalorder %s379_s8, %s375_s7 }
   0x7   : > { %p74_p2 = scmp.eq.s32.totalorder %s247_s12, 1  ;;  %p79_p3 = scmp.ne.s32.totalorder %s375_s7, %s371_s6 }
   0x8   : > { %s526_s14 = smov (%p28_p0, %s26_s14), 0  ;;  %p80_p5 = scmp.eq.s32.totalorder %s248_s13, 1 }
   0x9   : > { %p444_p4 = por %p74_p2, %p73_p1  ;;  %s58_s17 = ssub.s32 %s387_s10, %s526_s14 }
   0xa   : > { %p251_p6 = scmp.ge.s32.totalorder %s391_s11, 1  ;;  %p61_p7 = scmp.eq.s32.totalorder %s58_s17, 0 }
   0xb   : > { %p451_p8 = por %p80_p5, %p79_p3  ;;  %p109_p9 = scmp.lt.s32.totalorder %s391_s11, 3 }
   0xc   : > { %s457_s19 = scalar_select %p61_p7, %s379_s8, %s63_s15  }
   0xd   : > { %p110_p10 = pnand %p251_p6, %p109_p9 }
   0xe   : > { %p131_p11 = scmp.lt.s32.totalorder (!%p110_p10), %s383_s9, 1  ;;  %s129_s25 = sand.u32 (!%p110_p10), 1, %s375_s7   ;;  %vm161_vm0 = vcmask (!%p110_p10), 655360  }
   0xf   : > { %113 = sbr.rel (%p110_p10) target bundleno = 63 (0x3f), region = 24  ;;  %s130_s26 = scalar_lea.vmem (!%p110_p10), [#allocation2], %s129_s25 }
  0x10   : > { %s177_s27 = sshll.u32 (!%p110_p10), %s130_s26, 4  ;;  %s254_s28 = sshll.u32 (!%p110_p10), %s383_s9, 4  ;;  %s466_s27 = int_to_ptr.vmem [resolvable:$true] %s177_s27 }
  0x11   : > { %s471_s2 = scalar_lea.hbm (!%p110_p10), %s517_s1, %s254_s28  ;;  %s164_s3 = scalar_lea.sflag (!%p110_p10), [#allocation3], %s129_s25 }
  0x12   : > { %s313_s4 = scalar_lea.vmem (!%p110_p10), %s466_s27, 16  ;;  %s393_s5 = smov (!%p110_p10), [#allocation2]  }
  0x13   : > { %p314_p12 = scmp.ne.s32.totalorder (!%p110_p10), %s466_s27, %s313_s4 }
  0x15   : > { %p315_p13 = pnand (!%p110_p10), %p314_p12, %p444_p4 }
  0x16   : > { %s132_s20 = scalar_select %p131_p11, %s383_s9, 1 }
  0x17   : > { %p316_p0 = pneg %p315_p13  ;;  %s317_s9 = sshll.u32 %s393_s5, 4  ;;  %s318_s9 = int_to_ptr.vmem [resolvable:$false] %s317_s9 }
  0x18   : > { %s257_s21 = sshll.u32 %s132_s20, 4  ;;  %s319_s12 = scalar_lea.vmem %s318_s9, 32 }
  0x19   : > { %s138_s24 = scalar_lea.vmem %s516_s0, %s257_s21  ;;  %p320_p1 = scmp.lt.s32.totalorder %s466_s27, %s318_s9 }
  0x1a   : > { %v139_v0 = vld [vmem:[%s138_s24] sm:$0x1]  ;;  %v140_v1 = vld [vmem:[%s138_s24 + $0x1] sm:$0x1]  ;;  %v142_v2 = vld [vmem:[%s138_s24 + $0x2] sm:$0x1]  ;;  %p321_p2 = scmp.lt.s32.totalorder %s319_s12, %s313_s4 }
  0x1b   : > { %v141_v3 = vadd.f32 %v140_v1, %v139_v0  ;;  %v144_v4 = vld [vmem:[%s138_s24 + $0x3] sm:$0x1]  ;;  %v146_v6 = vld [vmem:[%s138_s24 + $0x4] sm:$0x1]  ;;  %v148_v8 = vld [vmem:[%s138_s24 + $0x5] sm:$0x1] }
  0x1c   : > { %v150_v10 = vld [vmem:[%s138_s24 + $0x6] sm:$0x1]  ;;  %v152_v12 = vld [vmem:[%s138_s24 + $0x7] sm:$0x1]  ;;  %v154_v14 = vld [vmem:[%s138_s24 + $0x8] sm:$0x1]  ;;  %p322_p3 = por %p321_p2, %p320_p1 }
  0x1d   : > { %v143_v5 = vadd.f32 %v142_v2, %v141_v3 }
  0x1e   : > { %p323_p5 = pnand %p322_p3, %p316_p0 }
  0x1f   : > { %v145_v7 = vadd.f32 %v144_v4, %v143_v5 }
  0x21   : > { %v147_v9 = vadd.f32 %v146_v6, %v145_v7 }
  0x23   : > { %v149_v11 = vadd.f32 %v148_v8, %v147_v9 }
  0x25   : > { %v151_v13 = vadd.f32 %v150_v10, %v149_v11 }
  0x27   : > { %v153_v15 = vadd.f32 %v152_v12, %v151_v13 }
  0x29   : > { %v155_v16 = vadd.f32 %v154_v14, %v153_v15 }
  0x2b   : > { %v157_v17 = vmax.f32 %v155_v16, 0.0  ;;  %v158_v18 = vsub.f32 2.0, %v155_v16 }
  0x2d   : > { %v159_v19 = vmax.f32 %v158_v18, 0.0 }
  0x2f   : > { %v160_v20 = vmul.f32 %v159_v19, %v157_v17 }
  0x31   : > { %162 = vst.msk [vmem:[%s130_s26] sm:$0x1] %vm161_vm0, %v160_v20 }
  0x32   : > { %326 = shalt.err (!%p323_p5)
}
  0x33   : > { %s327_s13 = scalar_lea.hbm %s471_s2, 16  ;;  %s331_s20 = scalar_lea.hbm %s517_s1, 32 }
  0x34   : > { %p328_p6 = scmp.ne.s32.totalorder %s471_s2, %s327_s13  ;;  %p332_p10 = scmp.lt.u32.totalorder %s471_s2, %s517_s1 }
  0x35   : > { %p333_p11 = scmp.lt.u32.totalorder %s331_s20, %s327_s13  ;;  %p335_p13 = scmp.lt.u32.totalorder %s327_s13, %s471_s2 }
  0x36   : > { %p329_p7 = pnand %p328_p6, %p444_p4 }
  0x37   : > { %p334_p12 = por %p333_p11, %p332_p10 }
  0x38   : > { %p330_p9 = pneg %p329_p7 }
  0x39   : > { %p336_p0 = por %p335_p13, %p334_p12 }
  0x3b   : > { %p337_p1 = pnand %p336_p0, %p330_p9 }
  0x3d   : > { %340 = shalt.err (!%p337_p1)
}
  0x3e   : > { %258 = dma.vmem_to_hbm [thread:$0]  (%p444_p4), %s466_s27, 16, %s471_s2, %s164_s3  }
  0x3f PF: > { %p264_p2 = scmp.ge.s32.totalorder %s391_s11, 2  ;;  %s189_s23 = sand.u32 1, %s371_s6  }
  0x40   : > { %s190_s24 = scalar_lea.sflag [#allocation3], %s189_s23 }
  0x41   : > { %p261_p3 = pnand %p264_p2, %p451_p8 }
  0x43   : > { %366 = dma.done.wait (!%p261_p3), %s190_s24, 16  }
  0x44   : > { %368 = vsyncadd (!%p261_p3), %s190_s24, 4294967280  ;;  %s14_s11 = sadd.s32 1, %s391_s11   ;;  %s520_s6 = smov %s375_s7 }
  0x45   : > { %p11_p5 = scmp.ge.s32.totalorder %s14_s11, 4   ;;  %s521_s7 = smov %s379_s8 }
  0x46   : > { %s522_s8 = smov %s457_s19  ;;  %s523_s9 = smov %s387_s10 }
  0x47   : > { %s524_s10 = smov %s526_s14  ;;  %13 = sbr.rel (!%p11_p5) target bundleno = 4 (0x4), region = 59 }
  0x4e   :  { %194 = vsyncpa [#allocation3], 1 }
  0x4f   :  { %196 = vsyncpa [#allocation3 + $0x1], 1 }

</bundles_post_ra>
